<compile_context>
chip_gen: v6e
topology: v6e:2x2x1
jax: 0.10.0
libtpu: 0.0.40
codegen_flags: <defaults>
</compile_context>

<pallas_src>
import jax
import jax.numpy as jnp
from jax import lax
from jax.experimental import pallas as pl
from jax.experimental.pallas import tpu as pltpu


def _maxpool2x2_kernel(x_ref, out_ref, idx_ref):
    # x_ref:   (ho_t, 2, Wo, 2*Lp)  row-pair strip; lane axis holds (col-pair, L)
    # out_ref: (ho_t, Wo, Lp)       pooled values
    # idx_ref: (ho_t, Wo, Lp)       int32 flat index into the (H*W) input plane
    ho_t, _, Wo, two_lp = x_ref.shape
    Lp = two_lp // 2
    W = 2 * Wo  # original input width (W is never split across the grid)

    # Window candidates.  Even/odd input row -> leading-dim ref index; even/odd
    # input column -> vreg-aligned lane slice (Lp % 128 == 0), so the whole
    # deinterleave is layout-free: no strided loads, no sublane shuffles.
    top = x_ref[:, 0, :, :]          # (ho_t, Wo, 2*Lp)
    bot = x_ref[:, 1, :, :]
    a = top[:, :, :Lp]               # (row, col)     = (2h,   2w)
    b = top[:, :, Lp:]               #                = (2h,   2w+1)
    c = bot[:, :, :Lp]               #                = (2h+1, 2w)
    d = bot[:, :, Lp:]               #                = (2h+1, 2w+1)

    # Row-major argmax over the 2x2 window; strict '>' keeps the earliest
    # position on ties (PyTorch scan order).  Only one int32 offset plane
    # (values in {0, 1, W, W+1}) is kept live.
    m = a
    off = jnp.zeros(a.shape, dtype=jnp.int32)
    gt = b > m
    m = jnp.where(gt, b, m)
    off = jnp.where(gt, jnp.int32(1), off)
    gt = c > m
    m = jnp.where(gt, c, m)
    off = jnp.where(gt, jnp.int32(W), off)
    gt = d > m
    m = jnp.where(gt, d, m)
    off = jnp.where(gt, jnp.int32(W + 1), off)

    # Lane-broadcast base index for this row-pair block: idx = ih*W + iw.
    row_pair0 = pl.program_id(0) * ho_t
    oh = lax.broadcasted_iota(jnp.int32, (ho_t, Wo, 1), 0)
    ow = lax.broadcasted_iota(jnp.int32, (ho_t, Wo, 1), 1)
    base = 2 * (row_pair0 + oh) * W + 2 * ow        # (ho_t, Wo, 1)

    out_ref[...] = m.astype(out_ref.dtype)
    idx_ref[...] = base + off


def _pick_ho_tile(Ho, row_pair_bytes, target_block_bytes, total_in_bytes):
    """Largest row-pair tile (divisor of Ho) whose input block fits the target.

    For non-trivial problems prefer an EVEN number of grid steps so a v7x
    megacore gets balanced work (no effect on single-TC v5e/v6e).
    """
    divisors = [t for t in range(1, Ho + 1) if Ho % t == 0]
    fits = [t for t in divisors if t * row_pair_bytes <= target_block_bytes]
    if not fits:
        fits = [1]
    if total_in_bytes > (1 << 20):
        even = [t for t in fits if (Ho // t) % 2 == 0]
        if even:
            return int(max(even))
    return int(max(fits))


def maxpool2x2_channels_last(x_cl, *, target_block_bytes=8 << 20):
    """MaxPool2d(2, 2, return_indices=True) on a channels-last (H, W, L) array.

    Zero wrapper transposes: this is the entry point a channels-last SegNet
    should call between layers.  Returns (pooled (Ho, Wo, L), idx (Ho, Wo, L))
    where idx is the int32 flat index into the (H*W) plane (PyTorch semantics).
    """
    H, W, L = x_cl.shape
    assert H % 2 == 0 and W % 2 == 0, "maxpool2x2 expects even H and W"
    Ho, Wo = H // 2, W // 2

    # Lane-dense insurance: pad L up to a multiple of 128 so both output planes
    # store with unmasked vst and lane slices in the kernel stay vreg-aligned.
    Lp = ((L + 127) // 128) * 128
    if Lp != L:
        x_cl = jnp.pad(x_cl, ((0, 0), (0, 0), (0, Lp - L)))

    # Free (order-preserving) reshape: fold the column pair into the lane axis.
    # (H, W, Lp) -> (Ho, 2, Wo, 2*Lp); no data movement.
    x_blk = x_cl.reshape(Ho, 2, Wo, 2 * Lp)

    elem = x_cl.dtype.itemsize
    row_pair_bytes = 2 * W * Lp * elem
    total_in_bytes = H * W * Lp * elem
    ho_tile = _pick_ho_tile(Ho, row_pair_bytes, target_block_bytes, total_in_bytes)
    grid = (Ho // ho_tile,)

    # VMEM budget: double-buffered input strip + both output strips, with
    # headroom; always override the 16 MiB scoped default (v5e).  With the
    # 8 MiB default target this stays well under v7x's 64 MiB physical VMEM.
    in_block = ho_tile * row_pair_bytes
    out_blocks = ho_tile * Wo * Lp * (elem + 4)
    vmem_bytes = int(max(32 << 20, 2.25 * (in_block + out_blocks)))

    # Pure-bandwidth kernel: flops ~ 0, traffic = input + values + indices.
    cost = pl.CostEstimate(
        flops=0, transcendentals=0,
        bytes_accessed=int(H * W * Lp * elem + Ho * Wo * Lp * (elem + 4)))

    grid_spec = pltpu.PrefetchScalarGridSpec(
        num_scalar_prefetch=0,
        grid=grid,
        in_specs=[
            pl.BlockSpec((ho_tile, 2, Wo, 2 * Lp), lambda i: (i, 0, 0, 0)),
        ],
        out_specs=[
            pl.BlockSpec((ho_tile, Wo, Lp), lambda i: (i, 0, 0)),
            pl.BlockSpec((ho_tile, Wo, Lp), lambda i: (i, 0, 0)),
        ],
    )

    pooled, idx = pl.pallas_call(
        _maxpool2x2_kernel,
        out_shape=(
            jax.ShapeDtypeStruct((Ho, Wo, Lp), x_cl.dtype),
            jax.ShapeDtypeStruct((Ho, Wo, Lp), jnp.int32),
        ),
        grid_spec=grid_spec,
        compiler_params=pltpu.CompilerParams(
            dimension_semantics=("parallel",),
            vmem_limit_bytes=vmem_bytes,
        ),
        cost_estimate=cost,
    )(x_blk)

    if Lp != L:
        pooled = pooled[..., :L]
        idx = idx[..., :L]
    return pooled, idx


def down_layer(x, *, target_block_bytes=8 << 20):
    """PyTorch-interface wrapper: x is NCHW; returns (pooled NCHW, idx NCHW).

    TODO(synk): the NCHW<->channels-last transposes below roughly triple HBM
    traffic for this op; in the full SegNet keep activations channels-last
    between layers (call `maxpool2x2_channels_last` directly) or fold the
    layout change into the adjacent convs.
    """
    N, C, H, W = x.shape
    assert H % 2 == 0 and W % 2 == 0, "down_layer expects even H and W"
    Ho, Wo = H // 2, W // 2
    NC = N * C

    x_cl = jnp.transpose(x.reshape(NC, H, W), (1, 2, 0))      # (H, W, NC)
    pooled_cl, idx_cl = maxpool2x2_channels_last(
        x_cl, target_block_bytes=target_block_bytes)

    pooled = jnp.transpose(pooled_cl, (2, 0, 1)).reshape(N, C, Ho, Wo)
    idx = jnp.transpose(idx_cl, (2, 0, 1)).reshape(N, C, Ho, Wo)
    return pooled, idx


def _reference(x):
    # Pure-JAX reference (PyTorch MaxPool2d(2,2,return_indices=True) semantics).
    N, C, H, W = x.shape
    Ho, Wo = H // 2, W // 2
    xr = x.reshape(N, C, Ho, 2, Wo, 2)
    win = xr.transpose(0, 1, 2, 4, 3, 5).reshape(N, C, Ho, Wo, 4)
    vals = win.max(axis=-1)
    arg = jnp.argmax(win, axis=-1).astype(jnp.int32)   # first max in window
    dy, dx = arg // 2, arg % 2
    oh = jnp.arange(Ho, dtype=jnp.int32)[None, None, :, None]
    ow = jnp.arange(Wo, dtype=jnp.int32)[None, None, None, :]
    idx = (2 * oh + dy) * W + (2 * ow + dx)
    return vals, idx


if __name__ == "__main__":
    key = jax.random.PRNGKey(0)
    x = jax.random.normal(key, (2, 4, 16, 16), dtype=jnp.float32)

    pooled, idx = down_layer(x)
    pooled = jax.block_until_ready(pooled)
    idx = jax.block_until_ready(idx)

    ref_vals, ref_idx = _reference(x)
    assert pooled.shape == (2, 4, 8, 8) and idx.shape == (2, 4, 8, 8)
    assert jnp.allclose(pooled, ref_vals)
    assert jnp.array_equal(idx, ref_idx)

    print("KERNEL_OK")
</pallas_src>

<mosaic_0001>
module attributes {stable_mosaic.version = 11 : i64} {
  func.func @_maxpool2x2_kernel(%arg0: i32, %arg1: memref<8x2x8x256xf32, #tpu.memory_space<vmem>>, %arg2: memref<8x8x128xf32, #tpu.memory_space<vmem>>, %arg3: memref<8x8x128xi32, #tpu.memory_space<vmem>>) attributes {dimension_semantics = [#tpu.dimension_semantics<parallel>], iteration_bounds = array<i64: 1>, scalar_prefetch = 0 : i64, scratch_operands = 0 : i64, tpu.core_type = #tpu.core_type<tc>, window_params = [{transform_indices = @transform_0, window_bounds = array<i64: 8, 2, 8, 256>}, {transform_indices = @transform_1, window_bounds = array<i64: 8, 8, 128>}, {transform_indices = @transform_2, window_bounds = array<i64: 8, 8, 128>}]} {
    %c0 = arith.constant 0 : index
    %c0_0 = arith.constant 0 : index
    %c0_1 = arith.constant 0 : index
    %c0_2 = arith.constant 0 : index
    %0 = vector.load %arg1[%c0, %c0_0, %c0_1, %c0_2] : memref<8x2x8x256xf32, #tpu.memory_space<vmem>>, vector<8x1x8x256xf32>
    %1 = vector.shape_cast %0 : vector<8x1x8x256xf32> to vector<8x8x256xf32>
    %c0_3 = arith.constant 0 : index
    %c1 = arith.constant 1 : index
    %c0_4 = arith.constant 0 : index
    %c0_5 = arith.constant 0 : index
    %2 = vector.load %arg1[%c0_3, %c1, %c0_4, %c0_5] : memref<8x2x8x256xf32, #tpu.memory_space<vmem>>, vector<8x1x8x256xf32>
    %3 = vector.shape_cast %2 : vector<8x1x8x256xf32> to vector<8x8x256xf32>
    %4 = vector.extract_strided_slice %1 {offsets = [0, 0, 0], sizes = [8, 8, 128], strides = [1, 1, 1]} : vector<8x8x256xf32> to vector<8x8x128xf32>
    %5 = vector.extract_strided_slice %1 {offsets = [0, 0, 128], sizes = [8, 8, 128], strides = [1, 1, 1]} : vector<8x8x256xf32> to vector<8x8x128xf32>
    %6 = vector.extract_strided_slice %3 {offsets = [0, 0, 0], sizes = [8, 8, 128], strides = [1, 1, 1]} : vector<8x8x256xf32> to vector<8x8x128xf32>
    %7 = vector.extract_strided_slice %3 {offsets = [0, 0, 128], sizes = [8, 8, 128], strides = [1, 1, 1]} : vector<8x8x256xf32> to vector<8x8x128xf32>
    %c0_i32 = arith.constant 0 : i32
    %8 = vector.broadcast %c0_i32 : i32 to vector<8x8x128xi32>
    %9 = arith.cmpf ogt, %5, %4 : vector<8x8x128xf32>
    %10 = arith.select %9, %5, %4 : vector<8x8x128xi1>, vector<8x8x128xf32>
    %c1_i32 = arith.constant 1 : i32
    %11 = vector.broadcast %c1_i32 : i32 to vector<8x8x128xi32>
    %12 = arith.select %9, %11, %8 : vector<8x8x128xi1>, vector<8x8x128xi32>
    %13 = arith.cmpf ogt, %6, %10 : vector<8x8x128xf32>
    %14 = arith.select %13, %6, %10 : vector<8x8x128xi1>, vector<8x8x128xf32>
    %c16_i32 = arith.constant 16 : i32
    %15 = vector.broadcast %c16_i32 : i32 to vector<8x8x128xi32>
    %16 = arith.select %13, %15, %12 : vector<8x8x128xi1>, vector<8x8x128xi32>
    %17 = arith.cmpf ogt, %7, %14 : vector<8x8x128xf32>
    %18 = arith.select %17, %7, %14 : vector<8x8x128xi1>, vector<8x8x128xf32>
    %c17_i32 = arith.constant 17 : i32
    %19 = vector.broadcast %c17_i32 : i32 to vector<8x8x128xi32>
    %20 = arith.select %17, %19, %16 : vector<8x8x128xi1>, vector<8x8x128xi32>
    %c8_i32 = arith.constant 8 : i32
    %21 = arith.muli %arg0, %c8_i32 : i32
    %22 = tpu.iota {dimensions = array<i32: 0>} : vector<8x8x1xi32>
    %23 = tpu.iota {dimensions = array<i32: 1>} : vector<8x8x1xi32>
    %24 = vector.broadcast %21 : i32 to vector<8x8x1xi32>
    %25 = arith.addi %24, %22 : vector<8x8x1xi32>
    %c2_i32 = arith.constant 2 : i32
    %26 = vector.broadcast %c2_i32 : i32 to vector<8x8x1xi32>
    %27 = arith.muli %26, %25 : vector<8x8x1xi32>
    %c16_i32_6 = arith.constant 16 : i32
    %28 = vector.broadcast %c16_i32_6 : i32 to vector<8x8x1xi32>
    %29 = arith.muli %27, %28 : vector<8x8x1xi32>
    %c2_i32_7 = arith.constant 2 : i32
    %30 = vector.broadcast %c2_i32_7 : i32 to vector<8x8x1xi32>
    %31 = arith.muli %30, %23 : vector<8x8x1xi32>
    %32 = arith.addi %29, %31 : vector<8x8x1xi32>
    %c0_8 = arith.constant 0 : index
    %c0_9 = arith.constant 0 : index
    %c0_10 = arith.constant 0 : index
    %33 = vector.load %arg2[%c0_8, %c0_9, %c0_10] : memref<8x8x128xf32, #tpu.memory_space<vmem>>, vector<8x8x128xf32>
    tpu.vector_store %arg2[%c0_8, %c0_9, %c0_10], %18 {strides = array<i32>} : memref<8x8x128xf32, #tpu.memory_space<vmem>>, vector<8x8x128xf32>,
    %34 = vector.broadcast %32 : vector<8x8x1xi32> to vector<8x8x128xi32>
    %35 = arith.addi %34, %20 : vector<8x8x128xi32>
    %c0_11 = arith.constant 0 : index
    %c0_12 = arith.constant 0 : index
    %c0_13 = arith.constant 0 : index
    %36 = vector.load %arg3[%c0_11, %c0_12, %c0_13] : memref<8x8x128xi32, #tpu.memory_space<vmem>>, vector<8x8x128xi32>
    tpu.vector_store %arg3[%c0_11, %c0_12, %c0_13], %35 {strides = array<i32>} : memref<8x8x128xi32, #tpu.memory_space<vmem>>, vector<8x8x128xi32>,
    return
  }
  func.func @transform_0(%arg0: i32) -> (i32, i32, i32, i32) {
    %c0_i32 = arith.constant 0 : i32
    %c0_i32_0 = arith.constant 0 : i32
    %c0_i32_1 = arith.constant 0 : i32
    %c0_i32_2 = arith.constant 0 : i32
    return %arg0, %c0_i32, %c0_i32_0, %c0_i32_1 : i32, i32, i32, i32
  }
  func.func @transform_1(%arg0: i32) -> (i32, i32, i32) {
    %c0_i32 = arith.constant 0 : i32
    %c0_i32_0 = arith.constant 0 : i32
    %c0_i32_1 = arith.constant 0 : i32
    return %arg0, %c0_i32, %c0_i32_0 : i32, i32, i32
  }
  func.func @transform_2(%arg0: i32) -> (i32, i32, i32) {
    %c0_i32 = arith.constant 0 : i32
    %c0_i32_0 = arith.constant 0 : i32
    %c0_i32_1 = arith.constant 0 : i32
    return %arg0, %c0_i32, %c0_i32_0 : i32, i32, i32
  }
}

</mosaic_0001>

<bundles_post_ra>
// kernel: tpu_custom_call.1
= control target key start
LH: loop header
LB: loop body
LE: loop exit
PB: predicated region body
PF: predicated region fallthrough
CT: control target
= control target key end

     0   :  { %8 = vsyncpa [#allocation3], 0  ;;  %s619_s0 = inlined_call_operand.hbm [shape: f32[8,2,8,256], index: 0, kind: input, shape index: {}]   ;;  %s620_s1 = inlined_call_operand.hbm [shape: f32[8,8,128], index: 1, kind: output, shape index: {0}]   ;;  %s621_s2 = inlined_call_operand.hbm [shape: s32[8,8,128], index: 2, kind: output, shape index: {1}]  }
   0x1   :  { %9 = vsyncpa [#allocation4], 0 }
   0x2   :  { %10 = vsyncpa [#allocation7], 0  ;;  %s298_s9 = smov [#allocation2]  }
   0x3   :  { %s16_s10 = sshll.u32 %s298_s9, 4  ;;  %s17_s10 = int_to_ptr.vmem [resolvable:$true] %s16_s10 }
   0x4   :  { %s240_s11 = scalar_lea.vmem %s17_s10, 4096  ;;  %p245_p1 = scmp.lt.s32.totalorder %s17_s10, %s17_s10 }
   0x5   :  { %p241_p0 = scmp.ne.s32.totalorder %s17_s10, %s240_s11  ;;  %p246_p2 = scmp.lt.s32.totalorder %s240_s11, %s240_s11 }
   0x7   :  { %p247_p3 = por %p246_p2, %p245_p1 }
   0x9   :  { %p248_p4 = pnand %p247_p3, %p241_p0 }
   0xb   :  { %251 = shalt.err (!%p248_p4)
}
   0xc   :  { %s299_s12 = smov 256   ;;  %s300_s13 = smov 16  }
   0xd   :  { %22 = dma.hbm_to_vmem [thread:$0]  %s619_s0, 4096, %s17_s10, [#allocation3], %s299_s12, %s299_s12, %s300_s13  }
   0xe   :  { %292 = dma.done.wait [#allocation3], 4096  }
   0xf   :  { %293 = vsyncadd [#allocation3], 4294963200  ;;  %v132_v0 = vlaneseq  ;;  %v26_v3 = vld [vmem:[#allocation2] sm:$0xff]  ;;  %v27_v4 = vld [vmem:[#allocation2 + $0x8] sm:$0xff]  ;;  %v301_v17 = vmov 0   ;;  %s302_s0 = smov [#allocation5]  }
  0x10   :  { %v43_v5 = vld [vmem:[#allocation2 + $0x10] sm:$0xff]  ;;  %vm59_vm0 = vcmp.gt.f32.partialorder %v27_v4, %v26_v3  ;;  %v28_v8 = vld [vmem:[#allocation2 + $0x20] sm:$0xff]  ;;  %v29_v9 = vld [vmem:[#allocation2 + $0x28] sm:$0xff]  ;;  %s196_s16 = sshll.u32 %s302_s0, 4  ;;  %s544_s16 = int_to_ptr.vmem [resolvable:$true] %s196_s16 }
  0x11   :  { %v133_v1 = vshrl.u32 %v132_v0, 7  ;;  %v341_v13 = vld [vmem:[#allocation2 + $0x18] sm:$0xff]  ;;  %v67_v14 = vsel %vm59_vm0, %v27_v4, %v26_v3  ;;  %v343_v15 = vld [vmem:[#allocation2 + $0x30] sm:$0xff]  ;;  %vm60_vm1 = vcmp.gt.f32.partialorder %v29_v9, %v28_v8  ;;  %v345_v16 = vld [vmem:[#allocation2 + $0x40] sm:$0xff]  ;;  %v75_v18 = vsel %vm59_vm0, 1, %v301_v17  ;;  %s252_s17 = scalar_lea.vmem %s544_s16, 1024  ;;  %p257_p6 = scmp.lt.s32.totalorder %s544_s16, %s544_s16 }
  0x12   :  { %vm83_vm2 = vcmp.gt.f32.partialorder %v43_v5, %v67_v14  ;;  %v351_v20 = vld [vmem:[#allocation2 + $0x38] sm:$0xff]  ;;  %v353_v21 = vsel %vm60_vm1, %v29_v9, %v28_v8  ;;  %v355_v22 = vld [vmem:[#allocation2 + $0x48] sm:$0xff]  ;;  %v357_v23 = vld [vmem:[#allocation2 + $0x50] sm:$0xff]  ;;  %v360_v24 = vsel %vm60_vm1, 1, %v301_v17  ;;  %p253_p5 = scmp.ne.s32.totalorder %s544_s16, %s252_s17  ;;  %p258_p7 = scmp.lt.s32.totalorder %s252_s17, %s252_s17 }
  0x13   :  { %v324_v2 = vmul.u32 2, %v133_v1  ;;  %v365_v26 = vsel %vm83_vm2, %v43_v5, %v67_v14  ;;  %vm84_vm3 = vcmp.gt.f32.partialorder %v343_v15, %v353_v21  ;;  %vm61_vm4 = vcmp.gt.f32.partialorder %v355_v22, %v345_v16  ;;  %v371_v27 = vld [vmem:[#allocation2 + $0x60] sm:$0xff]  ;;  %v373_v28 = vld [vmem:[#allocation2 + $0x68] sm:$0xff]  ;;  %v375_v29 = vld [vmem:[#allocation2 + $0x70] sm:$0xff] }
  0x14   :  { %v99_v30 = vsel %vm83_vm2, 16, %v75_v18  ;;  %vm107_vm5 = vcmp.gt.f32.partialorder %v341_v13, %v365_v26  ;;  %v384_v31 = vsel %vm84_vm3, %v343_v15, %v353_v21  ;;  %v386_v32 = vld [vmem:[#allocation2 + $0x58] sm:$0xff]  ;;  %v393_v33 = vsel %vm61_vm4, %v355_v22, %v345_v16  ;;  %v397_v34 = vld [vmem:[#allocation2 + $0x80] sm:$0xff]  ;;  %v399_v35 = vld [vmem:[#allocation2 + $0x88] sm:$0xff]  ;;  %p259_p8 = por %p258_p7, %p257_p6 }
  0x15   :  { %v327_v6 = vadd.s32 32, %v324_v2  ;;  %v330_v7 = vadd.s32 64, %v324_v2  ;;  %v333_v10 = vadd.s32 96, %v324_v2  ;;  %v336_v11 = vadd.s32 128, %v324_v2  ;;  %v410_v37 = vld [vmem:[#allocation2 + $0x78] sm:$0xff]  ;;  %v419_v39 = vld [vmem:[#allocation2 + $0x90] sm:$0xff] }
  0x16   :  { %v339_v12 = vadd.s32 160, %v324_v2  ;;  %v349_v19 = vadd.s32 192, %v324_v2  ;;  %v363_v25 = vadd.s32 224, %v324_v2  ;;  %vm62_vm6 = vcmp.gt.f32.partialorder %v373_v28, %v371_v27  ;;  %v421_v40 = vld [vmem:[#allocation2 + $0xa0] sm:$0xff]  ;;  %v437_v43 = vld [vmem:[#allocation2 + $0x98] sm:$0xff]  ;;  %v37_v44 = vld [vmem:[#allocation2 + $0xa8] sm:$0xff]  ;;  %p260_p9 = pnand %p259_p8, %p253_p5 }
  0x17   :  { %v115_v36 = vsel %vm107_vm5, %v341_v13, %v365_v26  ;;  %vm108_vm7 = vcmp.gt.f32.partialorder %v351_v20, %v384_v31  ;;  %vm85_vm8 = vcmp.gt.f32.partialorder %v357_v23, %v393_v33  ;;  %v417_v38 = vsel %vm62_vm6, %v373_v28, %v371_v27  ;;  %v441_v45 = vld [vmem:[#allocation2 + $0xb0] sm:$0xff]  ;;  %v455_v48 = vld [vmem:[#allocation2 + $0xb8] sm:$0xff]  ;;  %v458_v49 = vld [vmem:[#allocation2 + $0xc0] sm:$0xff] }
  0x18   :  { %167 = vst [vmem:[#allocation5] sm:$0xff] %v115_v36  ;;  %v116_v41 = vsel %vm108_vm7, %v351_v20, %v384_v31  ;;  %v433_v42 = vsel %vm85_vm8, %v357_v23, %v393_v33  ;;  %vm86_vm9 = vcmp.gt.f32.partialorder %v375_v29, %v417_v38  ;;  %vm63_vm10 = vcmp.gt.f32.partialorder %v399_v35, %v397_v34  ;;  %v460_v50 = vld [vmem:[#allocation2 + $0xc8] sm:$0xff]  ;;  %v472_v53 = vld [vmem:[#allocation2 + $0xd0] sm:$0xff]  ;;  %v474_v54 = vld [vmem:[#allocation2 + $0xe0] sm:$0xff] }
  0x19   :  { %168 = vst [vmem:[#allocation5 + $0x8] sm:$0xff] %v116_v41  ;;  %vm109_vm11 = vcmp.gt.f32.partialorder %v386_v32, %v433_v42  ;;  %v94_v46 = vsel %vm86_vm9, %v375_v29, %v417_v38  ;;  %v71_v47 = vsel %vm63_vm10, %v399_v35, %v397_v34  ;;  %vm64_vm12 = vcmp.gt.f32.partialorder %v37_v44, %v421_v40  ;;  %v476_v55 = vld [vmem:[#allocation2 + $0xe8] sm:$0xff]  ;;  %v487_v58 = vld [vmem:[#allocation2 + $0xf0] sm:$0xff]  ;;  %v493_v60 = vld [vmem:[#allocation2 + $0xd8] sm:$0xff] }
  0x1a   :  { %v117_v51 = vsel %vm109_vm11, %v386_v32, %v433_v42  ;;  %vm623_vm13 = vcmp.gt.f32.partialorder %v410_v37, %v94_v46  ;;  %vm622_vm14 = vcmp.gt.f32.partialorder %v419_v39, %v71_v47  ;;  %v72_v52 = vsel %vm64_vm12, %v37_v44, %v421_v40  ;;  %v507_v63 = vld [vmem:[#allocation2 + $0xf8] sm:$0xff] }
  0x1b   :  { %169 = vst [vmem:[#allocation5 + $0x10] sm:$0xff] %v117_v51  ;;  %v118_v56 = vsel %vm623_vm13, %v410_v37, %v94_v46  ;;  %v95_v57 = vsel %vm622_vm14, %v419_v39, %v71_v47  ;;  %vm88_vm15 = vcmp.gt.f32.partialorder %v441_v45, %v72_v52  ;;  %vm624_vm0 = vcmp.gt.f32.partialorder %v460_v50, %v458_v49 }
  0x1c   :  { %170 = vst [vmem:[#allocation5 + $0x18] sm:$0xff] %v118_v56  ;;  %vm111_vm1 = vcmp.gt.f32.partialorder %v437_v43, %v95_v57  ;;  %v96_v59 = vsel %vm88_vm15, %v441_v45, %v72_v52  ;;  %v73_v61 = vsel %vm624_vm0, %v460_v50, %v458_v49  ;;  %vm625_vm2 = vcmp.gt.f32.partialorder %v476_v55, %v474_v54 }
  0x1d   :  { %v119_v62 = vsel %vm111_vm1, %v437_v43, %v95_v57  ;;  %vm112_vm14 = vcmp.gt.f32.partialorder %v455_v48, %v96_v59  ;;  %vm89_vm13 = vcmp.gt.f32.partialorder %v472_v53, %v73_v61  ;;  %v74_v0 = vsel %vm625_vm2, %v476_v55, %v474_v54 }
  0x1e   :  { %171 = vst [vmem:[#allocation5 + $0x20] sm:$0xff] %v119_v62  ;;  %v120_v1 = vsel %vm112_vm14, %v455_v48, %v96_v59  ;;  %v97_v3 = vsel %vm89_vm13, %v472_v53, %v73_v61  ;;  %vm90_vm0 = vcmp.gt.f32.partialorder %v487_v58, %v74_v0  ;;  %v123_v4 = vsel %vm107_vm5, 17, %v99_v30 }
  0x1f   :  { %172 = vst [vmem:[#allocation5 + $0x28] sm:$0xff] %v120_v1  ;;  %vm113_vm2 = vcmp.gt.f32.partialorder %v493_v60, %v97_v3  ;;  %v98_v5 = vsel %vm90_vm0, %v487_v58, %v74_v0  ;;  %v175_v8 = vadd.s32 %v324_v2, %v123_v4  ;;  %v100_v9 = vsel %vm84_vm3, 16, %v360_v24 }
  0x20   :  { %v121_v14 = vsel %vm113_vm2, %v493_v60, %v97_v3  ;;  %vm114_vm5 = vcmp.gt.f32.partialorder %v507_v63, %v98_v5  ;;  %v124_v13 = vsel %vm108_vm7, 17, %v100_v9  ;;  %v77_v2 = vsel %vm61_vm4, 1, %v301_v17 }
  0x21   :  { %173 = vst [vmem:[#allocation5 + $0x30] sm:$0xff] %v121_v14  ;;  %v122_v15 = vsel %vm114_vm5, %v507_v63, %v98_v5  ;;  %183 = vst [vmem:[#allocation6] sm:$0xff] %v175_v8  ;;  %v176_v18 = vadd.s32 %v327_v6, %v124_v13  ;;  %v101_v20 = vsel %vm85_vm8, 16, %v77_v2  ;;  %v78_v16 = vsel %vm62_vm6, 1, %v301_v17 }
  0x22   :  { %174 = vst [vmem:[#allocation5 + $0x38] sm:$0xff] %v122_v15  ;;  %v125_v21 = vsel %vm109_vm11, 17, %v101_v20  ;;  %v102_v22 = vsel %vm86_vm9, 16, %v78_v16  ;;  %v79_v6 = vsel %vm63_vm10, 1, %v301_v17  ;;  %v80_v23 = vsel %vm64_vm12, 1, %v301_v17 }
  0x23   :  { %184 = vst [vmem:[#allocation6 + $0x8] sm:$0xff] %v176_v18  ;;  %v177_v24 = vadd.s32 %v330_v7, %v125_v21  ;;  %vm626_vm3 = vcmp.gt.f32.partialorder %v410_v37, %v94_v46  ;;  %vm627_vm4 = vcmp.gt.f32.partialorder %v419_v39, %v71_v47  ;;  %v104_v28 = vsel %vm88_vm15, 16, %v80_v23 }
  0x24   :  { %v126_v26 = vsel %vm626_vm3, 17, %v102_v22  ;;  %v103_v27 = vsel %vm627_vm4, 16, %v79_v6 }
  0x25   :  { %263 = shalt.err (!%p260_p9)
}
  0x26   :  { %s303_s18 = smov 128   ;;  %s304_s19 = smov 8   ;;  %v178_v7 = vadd.s32 %v333_v10, %v126_v26  ;;  %v127_v29 = vsel %vm111_vm1, 17, %v103_v27  ;;  %v128_v30 = vsel %vm112_vm14, 17, %v104_v28  ;;  %vm628_vm6 = vcmp.gt.f32.partialorder %v460_v50, %v458_v49  ;;  %185 = vst [vmem:[#allocation6 + $0x10] sm:$0xff] %v177_v24 }
  0x27   :  { %202 = dma.vmem_to_hbm [thread:$0]  %s544_s16, 1024, %s620_s1, [#allocation4], %s303_s18, %s303_s18, %s304_s19   ;;  %v81_v31 = vsel %vm628_vm6, 1, %v301_v17  ;;  %v179_v32 = vadd.s32 %v336_v11, %v127_v29  ;;  %v180_v33 = vadd.s32 %v339_v12, %v128_v30  ;;  %vm629_vm7 = vcmp.gt.f32.partialorder %v476_v55, %v474_v54 }
  0x28   :  { %v105_v34 = vsel %vm89_vm13, 16, %v81_v31  ;;  %v82_v10 = vsel %vm629_vm7, 1, %v301_v17  ;;  %s305_s1 = smov [#allocation6]   ;;  %186 = vst [vmem:[#allocation6 + $0x18] sm:$0xff] %v178_v7 }
  0x29   :  { %s208_s22 = sshll.u32 %s305_s1, 4  ;;  %v129_v35 = vsel %vm113_vm2, 17, %v105_v34  ;;  %v106_v36 = vsel %vm90_vm0, 16, %v82_v10  ;;  %187 = vst [vmem:[#allocation6 + $0x20] sm:$0xff] %v179_v32  ;;  %188 = vst [vmem:[#allocation6 + $0x28] sm:$0xff] %v180_v33  ;;  %s209_s22 = int_to_ptr.vmem [resolvable:$true] %s208_s22 }
  0x2a   :  { %v181_v11 = vadd.s32 %v349_v19, %v129_v35  ;;  %v130_v12 = vsel %vm114_vm5, 17, %v106_v36  ;;  %s272_s23 = scalar_lea.vmem %s209_s22, 1024  ;;  %p277_p11 = scmp.lt.s32.totalorder %s209_s22, %s209_s22 }
  0x2b   :  { %v182_v37 = vadd.s32 %v363_v25, %v130_v12  ;;  %p273_p10 = scmp.ne.s32.totalorder %s209_s22, %s272_s23  ;;  %p278_p12 = scmp.lt.s32.totalorder %s272_s23, %s272_s23 }
  0x2c   :  { %189 = vst [vmem:[#allocation6 + $0x30] sm:$0xff] %v181_v11 }
  0x2d   :  { %190 = vst [vmem:[#allocation6 + $0x38] sm:$0xff] %v182_v37  ;;  %p279_p13 = por %p278_p12, %p277_p11 }
  0x2f   :  { %p280_p0 = pnand %p279_p13, %p273_p10 }
  0x31   :  { %283 = shalt.err (!%p280_p0)
}
  0x32   :  { %214 = dma.vmem_to_hbm [thread:$0]  %s209_s22, 1024, %s621_s2, [#allocation7], %s303_s18, %s303_s18, %s304_s19  }
  0x33   :  { %294 = dma.done.wait [#allocation4], 1024  }
  0x34   :  { %295 = vsyncadd [#allocation4], 4294966272 }
  0x35   :  { %296 = dma.done.wait [#allocation7], 1024  }
  0x36   :  { %297 = vsyncadd [#allocation7], 4294966272 }
  0x37   :  { %221 = vsyncpa [#allocation3], 1 }
  0x38   :  { %222 = vsyncpa [#allocation4], 1 }
  0x39   :  { %223 = vsyncpa [#allocation7], 1 }

</bundles_post_ra>
